<compile_context>
chip_gen: v5e
topology: v5e:2x2
jax: 0.10.0
libtpu: 0.0.40
codegen_flags: <defaults>
</compile_context>

<pallas_src>
import functools

import numpy as np
import jax
import jax.numpy as jnp
from jax import lax
from jax.experimental import pallas as pl
from jax.experimental.pallas import tpu as pltpu


def _vmem_cap():
    """75% of physical VMEM (v5e/v6e: 128 MiB, v7x: 64 MiB); safe fallback."""
    try:
        return int(0.75 * pltpu.get_tpu_info().vmem_capacity_bytes)
    except Exception:  # pragma: no cover - conservative (v7x-sized) fallback
        return 48 << 20


# ---------------------------------------------------------------------------
# Kernel 1: gating (spatial mean + fused fc_a/fc_theta matmul + sigmoid).
#           Grid over N ("parallel"); spatial axis lane-dense (H*W flattened).
# ---------------------------------------------------------------------------
def _gating_kernel(x_ref, wab_ref, bab_ref, gate_ref, theta_ref, *,
                   E, proportion):
    # f32 accumulation of the spatial mean (important for bf16 inputs).
    avg = jnp.mean(x_ref[...].astype(jnp.float32), axis=-1)          # (Nb, C)
    logits = jnp.dot(avg, wab_ref[...],
                     preferred_element_type=jnp.float32) + bab_ref[...]  # (Nb, 2E)
    nb = avg.shape[0]
    gate_ref[...] = jax.nn.sigmoid(logits[:, :E]).reshape(nb, 1, E)
    theta_ref[...] = (jax.nn.sigmoid(logits[:, E:]) * proportion).reshape(nb, 1, E)


def gating(x2, wab, bab, *, proportion, block_rows=None):
    N, C, HW = x2.shape
    E2 = wab.shape[1]
    E = E2 // 2
    xb = x2.dtype.itemsize

    if block_rows is None:
        # biggest N-tile whose x block stays <= ~4 MiB
        block_rows = max(1, (4 << 20) // max(1, C * HW * xb))
    nb = max(1, min(int(block_rows), N))
    while N % nb:       # keep blocks exact (no partial blocks)
        nb -= 1

    need = (2 * nb * C * HW * xb        # double-buffered x block
            + nb * C * HW * 4           # f32 copy for the mean
            + 2 * C * E2 * 4 + 2 * E2 * 4 + 4 * nb * E * 4)
    cap = _vmem_cap()
    if need + (1 << 20) > cap:
        raise NotImplementedError(
            "gating block too large for VMEM; "
            "TODO(synk): chunk the H*W axis with a partial-sum scratch and an "
            "'arbitrary' reduction grid axis.")

    kern = functools.partial(_gating_kernel, E=E, proportion=float(proportion))
    gate, theta = pl.pallas_call(
        kern,
        out_shape=(jax.ShapeDtypeStruct((N, 1, E), jnp.float32),
                   jax.ShapeDtypeStruct((N, 1, E), jnp.float32)),
        grid=(N // nb,),
        in_specs=[pl.BlockSpec((nb, C, HW), lambda i: (i, 0, 0)),
                  pl.BlockSpec((C, E2), lambda i: (0, 0)),
                  pl.BlockSpec((1, E2), lambda i: (0, 0))],
        out_specs=(pl.BlockSpec((nb, 1, E), lambda i: (i, 0, 0)),
                   pl.BlockSpec((nb, 1, E), lambda i: (i, 0, 0))),
        compiler_params=pltpu.CompilerParams(
            dimension_semantics=("parallel",),
            vmem_limit_bytes=int(min(max(need * 2, 4 << 20), cap))),
    )(x2, wab, bab)
    return gate.reshape(N, E), theta.reshape(N, E)


# ---------------------------------------------------------------------------
# Kernel 2: fused per-sample expert-combine + grouped conv, grid=(groups, N).
#   x_ref : (1, 1, Cg, H*W)     lane-dense, UNPADDED input block
#   a_ref : (1, K*K, E*K*K)     per-sample mixing matrix  [p, e*K*K+q]
#   wt_ref: (1, E*K*K, Og*Cg)   per-group expert weights  [e*K*K+q, o*Cg+c]
#   o_ref : (1, 1, Og, Ho*Wo)   lane-dense output block
#   xpad  : VMEM scratch holding the zero-padded input
#             stride==1: flat (Cg, Hp*Wp + D*(K-1))
#             stride>1 : 3-D  (Cg, Hp, Wp)
# ---------------------------------------------------------------------------
def _conv_kernel(x_ref, a_ref, wt_ref, o_ref, xpad_ref, *,
                 K, stride, dilation, padding,
                 H, W, Hp, Wp, Ho, Wo, Og, Cg):
    KK = K * K
    D, S, P = dilation, stride, padding

    # (a) lane-dense per-sample/per-group expert combine: one small MXU matmul.
    w2 = jnp.dot(a_ref[0], wt_ref[0],
                 preferred_element_type=jnp.float32)          # (KK, Og*Cg)
    w_taps = w2.reshape(KK, Og, Cg)                           # [p, o, c]

    # (b) zero-padded copy of the input block in VMEM (zeroed every step so the
    #     kernel is megacore-safe; zeroing is full-lane-width -> cheap).
    # TODO(synk): replace the row loop by one manual strided DMA for large H.
    xpad_ref[...] = jnp.zeros_like(xpad_ref)

    if S == 1:
        if P == 0:
            xpad_ref[:, :H * W] = x_ref[0, 0]
        else:
            for h in range(H):
                dst = (h + P) * Wp + P
                xpad_ref[:, dst:dst + W] = x_ref[0, 0, :, h * W:(h + 1) * W]

        # (c) per-tap accumulate matmuls on contiguous lane-offset slices,
        #     computed at full Wp horizontal resolution (no per-tap relayout).
        Lw = Ho * Wp
        acc = jnp.zeros((Og, Lw), jnp.float32)
        for ky in range(K):
            for kx in range(K):
                p = ky * K + kx
                off = (ky * Wp + kx) * D
                acc = acc + jnp.dot(w_taps[p], xpad_ref[:, off:off + Lw],
                                    preferred_element_type=jnp.float32)

        # (d) compact the (Wp - Wo) garbage columns once; lane-dense output.
        for ho in range(Ho):
            o_ref[0, 0, :, ho * Wo:(ho + 1) * Wo] = (
                acc[:, ho * Wp:ho * Wp + Wo].astype(o_ref.dtype))
    else:
        # Strided fallback (stride > 1): per-tap strided slices from a 3-D
        # padded scratch.  No concat / no im2col slab, but still one
        # (Cg,Ho,Wo)->(Cg,Ho*Wo) relayout per tap.
        # TODO(synk): lane-strided compaction would remove these relayouts too.
        for h in range(H):
            xpad_ref[:, h + P, P:P + W] = x_ref[0, 0, :, h * W:(h + 1) * W]
        xp = xpad_ref[...]
        acc = jnp.zeros((Og, Ho * Wo), jnp.float32)
        for ky in range(K):
            for kx in range(K):
                p = ky * K + kx
                v = lax.slice(xp, (0, ky * D, kx * D),
                              (Cg, ky * D + (Ho - 1) * S + 1,
                               kx * D + (Wo - 1) * S + 1),
                              (1, S, S))                      # (Cg, Ho, Wo)
                acc = acc + jnp.dot(w_taps[p], v.reshape(Cg, Ho * Wo),
                                    preferred_element_type=jnp.float32)
        o_ref[0, 0] = acc.astype(o_ref.dtype)


def cond_conv(x, A, Wt, *, out_channels, stride, padding, dilation, groups, K):
    N, C, H, W = x.shape
    G = groups
    O = out_channels
    Cg = C // G
    Og = O // G
    P, D, S = padding, dilation, stride
    Hp, Wp = H + 2 * P, W + 2 * P
    Ho = (Hp - D * (K - 1) - 1) // S + 1
    Wo = (Wp - D * (K - 1) - 1) // S + 1
    KK = K * K
    EKK = A.shape[2]
    xb = x.dtype.itemsize

    # Free metadata reshape (no HBM pass): split channels by group, flatten HxW.
    x4 = x.reshape(N, G, Cg, H * W)

    if S == 1:
        scratch = pltpu.VMEM((Cg, Hp * Wp + D * (K - 1)), x.dtype)
        scratch_elems = Cg * (Hp * Wp + D * (K - 1))
        acc_elems = (Og + 2 * Cg) * Ho * Wp
    else:
        scratch = pltpu.VMEM((Cg, Hp, Wp), x.dtype)
        scratch_elems = Cg * Hp * Wp
        acc_elems = (Og + 2 * Cg) * Ho * Wo

    need = (2 * Cg * H * W * xb          # double-buffered x block
            + 2 * KK * EKK * 4           # mixing-matrix block
            + 2 * EKK * Og * Cg * 4      # expert-weight block
            + 2 * Og * Ho * Wo * xb      # output block
            + scratch_elems * xb         # padded-input scratch
            + acc_elems * 4)             # accumulator + tap temporaries
    cap = _vmem_cap()
    if need + (2 << 20) > cap:
        raise NotImplementedError(
            f"conv block needs ~{need >> 20} MiB VMEM (cap ~{cap >> 20} MiB); "
            "TODO(synk): tile the grid over Ho (with a dilation*(K-1) halo) "
            "and/or over Og for very large feature maps.")
    vmem_limit = int(min(max(int(need * 1.5) + (2 << 20), 8 << 20), cap))

    kern = functools.partial(_conv_kernel, K=K, stride=S, dilation=D,
                             padding=P, H=H, W=W, Hp=Hp, Wp=Wp,
                             Ho=Ho, Wo=Wo, Og=Og, Cg=Cg)
    out = pl.pallas_call(
        kern,
        out_shape=jax.ShapeDtypeStruct((N, G, Og, Ho * Wo), x.dtype),
        grid=(G, N),   # n iterates fastest -> expert-weight block stays VMEM-resident
        in_specs=[pl.BlockSpec((1, 1, Cg, H * W), lambda g, n: (n, g, 0, 0)),
                  pl.BlockSpec((1, KK, EKK), lambda g, n: (n, 0, 0)),
                  pl.BlockSpec((1, EKK, Og * Cg), lambda g, n: (g, 0, 0))],
        out_specs=pl.BlockSpec((1, 1, Og, Ho * Wo), lambda g, n: (n, g, 0, 0)),
        scratch_shapes=[scratch],
        compiler_params=pltpu.CompilerParams(
            dimension_semantics=("parallel", "parallel"),
            vmem_limit_bytes=vmem_limit),
    )(x4, A, Wt)
    return out.reshape(N, O, Ho, Wo)


# ---------------------------------------------------------------------------
# Plain-JAX glue: bilinear 3x3 rotation matrices R[n, e, p, q].
# ---------------------------------------------------------------------------
def rotation_matrices(theta):
    coords = jnp.array([-1.0, 0.0, 1.0], jnp.float32)
    yy, xx = jnp.meshgrid(coords, coords, indexing="ij")
    ty = yy.reshape(9)
    tx = xx.reshape(9)
    c = jnp.cos(theta)[..., None]                             # (N, E, 1)
    s = jnp.sin(theta)[..., None]
    ys = c * ty + s * tx                                      # (N, E, 9)
    xs = -s * ty + c * tx
    wy = jnp.maximum(0.0, 1.0 - jnp.abs(ys[..., :, None] - ty))   # (N, E, 9, 9)
    wx = jnp.maximum(0.0, 1.0 - jnp.abs(xs[..., :, None] - tx))
    return wy * wx


# ---------------------------------------------------------------------------
# Module
# ---------------------------------------------------------------------------
class CondRotConv2dPallas:
    def __init__(self, num_experts, in_channels, out_channels, kernel_size,
                 stride=1, padding=0, dilation=1, groups=1, bias=False,
                 padding_mode="zeros", proportion=1, key=None,
                 gating_block_rows=None):
        assert not bias
        assert padding_mode == "zeros"
        assert kernel_size == 3, "rotation path is defined for 3x3 kernels"
        self.num_experts = num_experts
        self.in_channels = in_channels
        self.out_channels = out_channels
        self.kernel_size = kernel_size
        self.stride = stride
        self.padding = padding
        self.dilation = dilation
        self.groups = groups
        self.proportion = proportion
        self.gating_block_rows = gating_block_rows

        k1, k2, k3, k4, k5 = jax.random.split(key, 5)
        E, O, G, K = num_experts, out_channels, groups, kernel_size
        Cg = in_channels // G
        Og = O // G
        KK = K * K
        fan = Cg * KK
        # nn.Parameter(num_experts*out, in//g, k, k); deterministic random init.
        self.weight = (jax.random.normal(
            k1, (E * O, Cg, K, K), jnp.float32) * (1.0 / fan) ** 0.5)
        # fc_a / fc_theta: nn.Linear(in_channels, num_experts).  (zero_init
        # would make the gating degenerate, so use small deterministic randoms.)
        self.wa = jax.random.normal(k2, (E, in_channels), jnp.float32) * 0.2
        self.ba = jax.random.normal(k3, (E,), jnp.float32) * 0.1
        self.wt = jax.random.normal(k4, (E, in_channels), jnp.float32) * 0.2
        self.bt = jax.random.normal(k5, (E,), jnp.float32) * 0.1

        # Precomputed, kernel-friendly layouts (host-side, done once):
        #   fused gating weights: (C, 2E), (1, 2E)
        self.wab = jnp.concatenate([self.wa.T, self.wt.T], axis=1)
        self.bab = jnp.concatenate([self.ba, self.bt]).reshape(1, 2 * E)
        #   per-group expert weights: Wt[g, e*KK+q, o*Cg+c]
        W6 = self.weight.reshape(E, G, Og, Cg, KK)            # [e, g, o, c, q]
        self.wt_g = W6.transpose(1, 0, 4, 2, 3).reshape(G, E * KK, Og * Cg)

    def __call__(self, x):
        N, C, H, W = x.shape
        E, O, G, K = (self.num_experts, self.out_channels,
                      self.groups, self.kernel_size)

        # 1) gating (Pallas, tiled over N, fused fc_a/fc_theta)
        gate, theta = gating(x.reshape(N, C, H * W), self.wab, self.bab,
                             proportion=self.proportion,
                             block_rows=self.gating_block_rows)

        # 2) rotation matrices + per-sample mixing matrices (tiny glue)
        R = rotation_matrices(theta)                          # (N, E, 9, 9) [n,e,p,q]
        A = ((gate[:, :, None, None] * R)
             .transpose(0, 2, 1, 3)
             .reshape(N, K * K, E * K * K))                   # [n, p, e*9+q]

        # 3+4) fused per-sample expert-combine + grouped conv (Pallas)
        return cond_conv(x, A, self.wt_g, out_channels=O, stride=self.stride,
                         padding=self.padding, dilation=self.dilation,
                         groups=G, K=K)


# ---------------------------------------------------------------------------
# Pure-JAX reference (mirrors the PyTorch forward)
# ---------------------------------------------------------------------------
def reference_forward(m, x):
    N, C, H, W = x.shape
    E, O, g, K = m.num_experts, m.out_channels, m.groups, m.kernel_size
    Cg = C // g
    avg = x.mean(axis=(2, 3))
    gate = jax.nn.sigmoid(avg @ m.wa.T + m.ba)
    theta = jax.nn.sigmoid(avg @ m.wt.T + m.bt) * m.proportion
    R = rotation_matrices(theta)
    W5 = m.weight.reshape(E, O, Cg, K * K)
    rot = jnp.einsum("nepq,eocq->neocp", R, W5)
    w_out = jnp.einsum("ne,neocp->nocp", gate, rot).reshape(N * O, Cg, K, K)
    xr = x.reshape(1, N * C, H, W)
    out = lax.conv_general_dilated(
        xr, w_out, window_strides=(m.stride, m.stride),
        padding=[(m.padding, m.padding)] * 2,
        rhs_dilation=(m.dilation, m.dilation),
        dimension_numbers=("NCHW", "OIHW", "NCHW"),
        feature_group_count=N * g)
    return out.reshape(N, O, out.shape[2], out.shape[3])


if __name__ == "__main__":
    key = jax.random.PRNGKey(0)

    configs = [
        # (N, Cin, Cout, H, W, E, stride, padding, dilation, groups, gating_nb)
        dict(N=2, Cin=4, Cout=8, H=16, W=16, E=4,
             stride=1, padding=1, dilation=1, groups=1, gnb=None),
        dict(N=3, Cin=8, Cout=8, H=16, W=16, E=4,
             stride=1, padding=1, dilation=1, groups=2, gnb=1),   # groups>1, Og=4
        dict(N=2, Cin=4, Cout=8, H=16, W=16, E=4,
             stride=2, padding=1, dilation=1, groups=1, gnb=None),  # strided path
        dict(N=2, Cin=4, Cout=8, H=16, W=16, E=4,
             stride=1, padding=2, dilation=2, groups=1, gnb=None),  # dilated path
    ]

    for cfg in configs:
        key, kx, kp = jax.random.split(key, 3)
        module = CondRotConv2dPallas(
            cfg["E"], cfg["Cin"], cfg["Cout"], 3,
            stride=cfg["stride"], padding=cfg["padding"],
            dilation=cfg["dilation"], groups=cfg["groups"],
            bias=False, proportion=1, key=kp,
            gating_block_rows=cfg["gnb"])

        x = jax.random.normal(kx, (cfg["N"], cfg["Cin"], cfg["H"], cfg["W"]),
                              jnp.float32)

        out = jax.block_until_ready(module(x))
        ref = jax.block_until_ready(reference_forward(module, x))
        assert out.shape == ref.shape, (out.shape, ref.shape)
        np.testing.assert_allclose(np.asarray(out), np.asarray(ref),
                                   rtol=1e-3, atol=1e-3)

    print("KERNEL_OK")
</pallas_src>

<mosaic_0001>
module attributes {stable_mosaic.version = 11 : i64} {
  func.func @_gating_kernel(%arg0: i32, %arg1: memref<2x4x256xf32, #tpu.memory_space<vmem>>, %arg2: memref<4x8xf32, #tpu.memory_space<vmem>>, %arg3: memref<1x8xf32, #tpu.memory_space<vmem>>, %arg4: memref<2x1x4xf32, #tpu.memory_space<vmem>>, %arg5: memref<2x1x4xf32, #tpu.memory_space<vmem>>) attributes {dimension_semantics = [#tpu.dimension_semantics<parallel>], iteration_bounds = array<i64: 1>, scalar_prefetch = 0 : i64, scratch_operands = 0 : i64, tpu.core_type = #tpu.core_type<tc>, window_params = [{transform_indices = @transform_0, window_bounds = array<i64: 2, 4, 256>}, {pipeline_mode = #tpu.pipeline_mode<synchronous>, transform_indices = @transform_1, window_bounds = array<i64: 4, 8>}, {pipeline_mode = #tpu.pipeline_mode<synchronous>, transform_indices = @transform_2, window_bounds = array<i64: 1, 8>}, {transform_indices = @transform_3, window_bounds = array<i64: 2, 1, 4>}, {transform_indices = @transform_4, window_bounds = array<i64: 2, 1, 4>}]} {
    %c0 = arith.constant 0 : index
    %c0_0 = arith.constant 0 : index
    %c0_1 = arith.constant 0 : index
    %0 = vector.load %arg1[%c0, %c0_0, %c0_1] : memref<2x4x256xf32, #tpu.memory_space<vmem>>, vector<2x4x256xf32>
    %cst = arith.constant dense<0.000000e+00> : vector<2x4xf32>
    %1 = vector.multi_reduction <add>, %0, %cst [2] : vector<2x4x256xf32> to vector<2x4xf32>
    %cst_2 = arith.constant 2.560000e+02 : f32
    %2 = vector.broadcast %cst_2 : f32 to vector<2x4xf32>
    %3 = arith.divf %1, %2 : vector<2x4xf32>
    %c0_3 = arith.constant 0 : index
    %c0_4 = arith.constant 0 : index
    %4 = vector.load %arg2[%c0_3, %c0_4] : memref<4x8xf32, #tpu.memory_space<vmem>>, vector<4x8xf32>
    %cst_5 = arith.constant dense<0.000000e+00> : vector<2x8xf32>
    %5 = tpu.matmul %3, %4, %cst_5 {dimension_numbers = #tpu.dot_dimension_numbers<[1], [0], [0], [1], [0, 0, 1, 1], [], []>} : vector<2x4xf32>, vector<4x8xf32>, vector<2x8xf32> -> vector<2x8xf32>
    %c0_6 = arith.constant 0 : index
    %c0_7 = arith.constant 0 : index
    %6 = vector.load %arg3[%c0_6, %c0_7] : memref<1x8xf32, #tpu.memory_space<vmem>>, vector<1x8xf32>
    %7 = vector.broadcast %6 : vector<1x8xf32> to vector<2x8xf32>
    %8 = arith.addf %5, %7 : vector<2x8xf32>
    %9 = vector.extract_strided_slice %8 {offsets = [0, 0], sizes = [2, 4], strides = [1, 1]} : vector<2x8xf32> to vector<2x4xf32>
    %10 = arith.negf %9 : vector<2x4xf32>
    %11 = math.exp %10 : vector<2x4xf32>
    %cst_8 = arith.constant 1.000000e+00 : f32
    %12 = vector.broadcast %cst_8 : f32 to vector<2x4xf32>
    %13 = arith.addf %12, %11 : vector<2x4xf32>
    %14 = arith.divf %12, %13 : vector<2x4xf32>
    %15 = vector.shape_cast %14 : vector<2x4xf32> to vector<2x1x4xf32>
    %c0_9 = arith.constant 0 : index
    %c0_10 = arith.constant 0 : index
    %c0_11 = arith.constant 0 : index
    %16 = vector.load %arg4[%c0_9, %c0_10, %c0_11] : memref<2x1x4xf32, #tpu.memory_space<vmem>>, vector<2x1x4xf32>
    tpu.vector_store %arg4[%c0_9, %c0_10, %c0_11], %15 {strides = array<i32>} : memref<2x1x4xf32, #tpu.memory_space<vmem>>, vector<2x1x4xf32>,
    %17 = vector.extract_strided_slice %8 {offsets = [0, 4], sizes = [2, 4], strides = [1, 1]} : vector<2x8xf32> to vector<2x4xf32>
    %18 = arith.negf %17 : vector<2x4xf32>
    %19 = math.exp %18 : vector<2x4xf32>
    %cst_12 = arith.constant 1.000000e+00 : f32
    %20 = vector.broadcast %cst_12 : f32 to vector<2x4xf32>
    %21 = arith.addf %20, %19 : vector<2x4xf32>
    %22 = arith.divf %20, %21 : vector<2x4xf32>
    %cst_13 = arith.constant 1.000000e+00 : f32
    %23 = vector.broadcast %cst_13 : f32 to vector<2x4xf32>
    %24 = arith.mulf %22, %23 : vector<2x4xf32>
    %25 = vector.shape_cast %24 : vector<2x4xf32> to vector<2x1x4xf32>
    %c0_14 = arith.constant 0 : index
    %c0_15 = arith.constant 0 : index
    %c0_16 = arith.constant 0 : index
    %26 = vector.load %arg5[%c0_14, %c0_15, %c0_16] : memref<2x1x4xf32, #tpu.memory_space<vmem>>, vector<2x1x4xf32>
    tpu.vector_store %arg5[%c0_14, %c0_15, %c0_16], %25 {strides = array<i32>} : memref<2x1x4xf32, #tpu.memory_space<vmem>>, vector<2x1x4xf32>,
    return
  }
  func.func @transform_0(%arg0: i32) -> (i32, i32, i32) {
    %c0_i32 = arith.constant 0 : i32
    %c0_i32_0 = arith.constant 0 : i32
    %c0_i32_1 = arith.constant 0 : i32
    return %arg0, %c0_i32, %c0_i32_0 : i32, i32, i32
  }
  func.func @transform_1(%arg0: i32) -> (i32, i32) {
    %c0_i32 = arith.constant 0 : i32
    %c0_i32_0 = arith.constant 0 : i32
    %c0_i32_1 = arith.constant 0 : i32
    return %c0_i32, %c0_i32_0 : i32, i32
  }
  func.func @transform_2(%arg0: i32) -> (i32, i32) {
    %c0_i32 = arith.constant 0 : i32
    %c0_i32_0 = arith.constant 0 : i32
    %c0_i32_1 = arith.constant 0 : i32
    return %c0_i32, %c0_i32_0 : i32, i32
  }
  func.func @transform_3(%arg0: i32) -> (i32, i32, i32) {
    %c0_i32 = arith.constant 0 : i32
    %c0_i32_0 = arith.constant 0 : i32
    %c0_i32_1 = arith.constant 0 : i32
    return %arg0, %c0_i32, %c0_i32_0 : i32, i32, i32
  }
  func.func @transform_4(%arg0: i32) -> (i32, i32, i32) {
    %c0_i32 = arith.constant 0 : i32
    %c0_i32_0 = arith.constant 0 : i32
    %c0_i32_1 = arith.constant 0 : i32
    return %arg0, %c0_i32, %c0_i32_0 : i32, i32, i32
  }
}

</mosaic_0001>

<bundles_post_ra>
// kernel: tpu_custom_call.1
= control target key start
LH: loop header
LB: loop body
LE: loop exit
PB: predicated region body
PF: predicated region fallthrough
CT: control target
= control target key end

     0   :  { %10 = vsyncpa [#allocation3], 0  ;;  %s378_s0 = inlined_call_operand.hbm [shape: f32[2,4,256], index: 0, kind: input, shape index: {}]   ;;  %s379_s1 = inlined_call_operand.hbm [shape: f32[4,8], index: 1, kind: input, shape index: {}]   ;;  %s380_s2 = inlined_call_operand.vmem [shape: f32[1,8], index: 2, kind: input, shape index: {}]   ;;  %s381_s3 = inlined_call_operand.hbm [shape: f32[2,1,4], index: 3, kind: output, shape index: {0}]   ;;  %s382_s4 = inlined_call_operand.hbm [shape: f32[2,1,4], index: 4, kind: output, shape index: {1}]  }
   0x1   :  { %11 = vsyncpa [#allocation6], 0 }
   0x2   :  { %12 = vsyncpa [#allocation4], 0 }
   0x3   :  { %13 = vsyncpa [#allocation9], 0  ;;  %s18_s17 = sshll.u32 %s378_s0, 4  ;;  %s319_s18 = smov [#allocation2]   ;;  %s19_s17 = int_to_ptr.hbm [resolvable:$true] %s18_s17 }
   0x4   :  { %s20_s19 = sshll.u32 %s319_s18, 4  ;;  %s32_s22 = sshll.u32 %s379_s1, 4  ;;  %s21_s19 = int_to_ptr.vmem [resolvable:$true] %s20_s19  ;;  %s33_s22 = int_to_ptr.hbm [resolvable:$true] %s32_s22 }
   0x5   :  { %s320_s23 = smov 128   ;;  %s321_s24 = smov 8  }
   0x6   :  { %26 = dma.hbm_to_vmem [thread:$0]  %s19_s17, 256, %s21_s19, [#allocation3], %s320_s23, %s320_s23, %s321_s24  }
   0x7   :  { %s322_s25 = smov [#allocation5]  }
   0x8   :  { %s34_s26 = sshll.u32 %s322_s25, 4  ;;  %s35_s26 = int_to_ptr.vmem [resolvable:$true] %s34_s26 }
   0x9   :  { %37 = dma.hbm_to_vmem [thread:$0]  %s33_s22, 64, %s35_s26, [#allocation6]  }
   0xa   :  { %311 = dma.done.wait [#allocation3], 256  }
   0xb   :  { %312 = vsyncadd [#allocation3], 4294967040 }
   0xc   :  { %313 = dma.done.wait [#allocation6], 64  }
   0xd   :  { %314 = vsyncadd [#allocation6], 4294967232  ;;  %v48_v0 = vld [vmem:[#allocation2] sm:$0xff]  ;;  %v49_v1 = vld [vmem:[#allocation2 + $0x8] sm:$0xff]  ;;  %vm63_vm0 = vcmask 1043456   ;;  %v323_v12 = vmov 256.0   ;;  %v90_v20 = vlaneseq }
   0xe   :  { %52 = vst [vmem:[#allocation1] ss:$2 sm:$0xff] %v48_v0  ;;  %209 = vrcp.f32 %v323_v12  ;;  %v83_v13 = vld [vmem:[#allocation5] sm:$0xf]  ;;  %vm94_vm2 = vcmask 1041409   ;;  %vm96_vm3 = vcmask 31744  }
   0xf   :  { %56 = vst [vmem:[#allocation1 + $0x10] ss:$2 sm:$0xff] %v49_v1  ;;  %195 = vmatpush.msk.msra.mxu0 %vm63_vm0, %v83_v13  ;;  %v91_v22 = vand.u32 127, %v90_v20  ;;  %v208_v29 = vld [vmem:[%s380_s2] ss:$0 sm:$0xff]  ;;  %s324_s27 = smov [#allocation7]  }
  0x10   :  { %s161_s28 = sshll.u32 %s324_s27, 4  ;;  %s163_s30 = sshll.u32 %s381_s3, 4  ;;  %vm144_vm7 = vcmask 24576   ;;  %s162_s28 = int_to_ptr.vmem [resolvable:$true] %s161_s28  ;;  %s164_s30 = int_to_ptr.hbm [resolvable:$true] %s163_s30 }
  0x11   :  { %s325_s5 = smov 124   ;;  %s326_s6 = smov 16  }
  0x12   :  { %s327_s7 = smov 1   ;;  %s328_s3 = smov [#allocation8]  }
  0x13   :  { %s174_s8 = sshll.u32 %s328_s3, 4  ;;  %s176_s11 = sshll.u32 %s382_s4, 4  ;;  %s175_s8 = int_to_ptr.vmem [resolvable:$true] %s174_s8  ;;  %s177_s11 = int_to_ptr.hbm [resolvable:$true] %s176_s11 }
  0x14   :  { %v210_v14 = vpop.eup %209 }
  0x15   :  { %v53_v2 = vld.sshfl [vmem:[#allocation1] sm:$0xff pattern:$0x75316420]  ;;  %v54_v3 = vld.sshfl [vmem:[#allocation1 + $0x8] sm:$0xff pattern:$0x75316420]  ;;  %vm79_vm1 = vweird.f32 %v210_v14 }
  0x16   :  { %v64_v4 = vsel %vm63_vm0, %v53_v2, 0.0  ;;  %v65_v5 = vsel %vm63_vm0, %v54_v3, 0.0  ;;  %v57_v7 = vld.sshfl [vmem:[#allocation1 + $0x10] sm:$0xff pattern:$0x75316420]  ;;  %v75_v15 = vmul.f32 256.0, %v210_v14 }
  0x17   :  { %v66_v6 = vadd.f32 %v65_v5, %v64_v4  ;;  %v58_v8 = vld.sshfl [vmem:[#allocation1 + $0x18] sm:$0xff pattern:$0x75316420]  ;;  %v69_v9 = vsel %vm63_vm0, %v57_v7, 0.0 }
  0x18   :  { %v70_v10 = vsel %vm63_vm0, %v58_v8, 0.0  ;;  %v76_v16 = vsub.f32 1.0, %v75_v15 }
  0x19   :  { %67 = vadd.xlane.f32.xlu0 %v66_v6  ;;  %v71_v11 = vadd.f32 %v70_v10, %v69_v9 }
  0x1a   :  { %v77_v17 = vmul.f32 %v210_v14, %v76_v16 }
  0x1c   :  { %v78_v18 = vadd.f32 %v210_v14, %v77_v17 }
  0x1e   :  { %v80_v21 = vsel %vm79_vm1, %v210_v14, %v78_v18 }
  0x21   :  { %72 = vadd.xlane.f32.xlu0 %v71_v11 }
  0x8c   :  { %v68_v19 = vpop.xlane.xlu0 %67 }
  0x8d   :  { %v81_v23 = vmul.f32 %v80_v21, %v68_v19 }
  0x8f   :  { %v92_v26 = vperm.slane %v81_v23, %v91_v22 }
  0x94   :  { %v73_v24 = vpop.xlane.xlu0 %72 }
  0x95   :  { %v82_v25 = vmul.f32 %v80_v21, %v73_v24 }
  0x97   :  { %v93_v27 = vperm.slane %v82_v25, %v91_v22 }
  0x99   :  { %v95_v28 = vsel %vm94_vm2, %v93_v27, %v92_v26 }
  0x9a   :  { %196 = vmatmul.msk.f32.vlgmr.msra.gmra.mxu0 %vm96_vm3, %v95_v28 }
 0x117   :  { %v119_v30 = vpop.f32.mrf.mxu0 }
 0x118   :  { %v120_v31 = vadd.f32 %v208_v29, %v119_v30 }
 0x11a   :  { %v197_v32 = vmul.f32 -1.442695, %v120_v31 }
 0x11c   :  { %211 = vpow2.f32 %v197_v32 }
 0x122   :  { %v212_v33 = vpop.eup %211 }
 0x123   :  { %v125_v34 = vadd.f32 1.0, %v212_v33 }
 0x125   :  { %213 = vrcp.f32 %v125_v34  ;;  %v137_v38 = vand.u32 2147483648, %v125_v34  ;;  %v135_v40 = vand.u32 2147483647, %v125_v34  ;;  %vm131_vm5 = vweird.f32 %v125_v34 }
 0x127   :  { %v138_v42 = vor.u32 1.1754944e-38, %v137_v38  ;;  %vm136_vm8 = vcmp.eq.f32.partialorder %v135_v40, 8.507059e+37 }
 0x12b   :  { %v214_v35 = vpop.eup %213 }
 0x12c   :  { %v127_v36 = vmul.f32 %v214_v35, %v125_v34  ;;  %vm132_vm4 = vweird.f32 %v214_v35 }
 0x12d   :  { %vm133_vm6 = vmor %vm131_vm5, %vm132_vm4 }
 0x12e   :  { %v128_v37 = vsub.f32 1.0, %v127_v36 }
 0x130   :  { %v129_v39 = vmul.f32 %v214_v35, %v128_v37 }
 0x132   :  { %v130_v41 = vadd.f32 %v214_v35, %v129_v39 }
 0x134   :  { %v134_v43 = vsel %vm133_vm6, %v214_v35, %v130_v41 }
 0x135   :  { %v139_v44 = vsel %vm136_vm8, %v138_v42, %v134_v43 }
 0x136   :  { %v147_v45 = vperm.slane %v139_v44, 0  ;;  %v142_v46 = vrot.slane %v139_v44, 1  ;;  %145 = vst.msk [vmem:[#allocation7] sm:$0x1] %vm144_vm7, %v139_v44 }
 0x138   :  { %149 = vrot.lane.b32.xlu1 %v147_v45, %s325_s5  ;;  %146 = vst.msk [vmem:[#allocation7 + $0x1] sm:$0x1] %vm144_vm7, %v142_v46  ;;  %v148_v47 = vperm.slane %v142_v46, 0 }
 0x139   :  { %169 = dma.vmem_to_hbm [thread:$0]  %s162_s28, 32, %s164_s30, [#allocation4], %s326_s6, %s326_s6, %s327_s7  }
 0x140   :  { %151 = vrot.lane.b32.xlu1 %v148_v47, %s325_s5 }
 0x1aa   :  { %v150_v48 = vpop.permute.xlu1 %149 }
 0x1ab   :  { %155 = vst.msk [vmem:[#allocation8] sm:$0x1] %vm144_vm7, %v150_v48 }
 0x1b2   :  { %v152_v49 = vpop.permute.xlu1 %151 }
 0x1b3   :  { %156 = vst.msk [vmem:[#allocation8 + $0x1] sm:$0x1] %vm144_vm7, %v152_v49 }
 0x1b4   :  { %182 = dma.vmem_to_hbm [thread:$0]  %s175_s8, 32, %s177_s11, [#allocation9], %s326_s6, %s326_s6, %s327_s7  }
 0x1b5   :  { %315 = dma.done.wait [#allocation4], 32  }
 0x1b6   :  { %316 = vsyncadd [#allocation4], 4294967264 }
 0x1b7   :  { %317 = dma.done.wait [#allocation9], 32  }
 0x1b8   :  { %318 = vsyncadd [#allocation9], 4294967264 }
 0x1b9   :  { %191 = vsyncpa [#allocation3], 1 }
 0x1ba   :  { %192 = vsyncpa [#allocation6], 1 }
 0x1bb   :  { %193 = vsyncpa [#allocation4], 1 }
 0x1bc   :  { %194 = vsyncpa [#allocation9], 1 }

</bundles_post_ra>
